<compile_context>
chip_gen: v6e
topology: v6e:2x2x1
jax: 0.10.0
libtpu: 0.0.40
codegen_flags: <defaults>
</compile_context>

<pallas_src>
import functools

import jax
import jax.numpy as jnp
from jax import lax
from jax.experimental import pallas as pl
from jax.experimental.pallas import tpu as pltpu


# ---------------------------------------------------------------------------
# Pallas kernel: fused (space-to-depth) conv 2x2/s2 + BN bias + ReLU
# ---------------------------------------------------------------------------

def _ds2_kernel(x_ref, w_ref, b_ref, o_ref):
    # x_ref: (TR, 2, Wk, K2)  input dtype (f32/bf16)  -- K2 = 2*Cin
    # w_ref: (2, K2, TN)      bf16, BN scale already folded in
    # b_ref: (1, TN)          f32
    # o_ref: (TR*Wk, TN)      out dtype (bf16 by default)
    tr, _, wk, k2 = x_ref.shape
    x0 = x_ref[:, 0, :, :].reshape(tr * wk, k2).astype(jnp.bfloat16)   # kh = 0
    x1 = x_ref[:, 1, :, :].reshape(tr * wk, k2).astype(jnp.bfloat16)   # kh = 1
    acc = jnp.dot(x0, w_ref[0], preferred_element_type=jnp.float32)
    acc = acc + jnp.dot(x1, w_ref[1], preferred_element_type=jnp.float32)
    o_ref[...] = jnp.maximum(acc + b_ref[...], 0.0).astype(o_ref.dtype)


def _pick_tiles(R, Wk, K2, Cout):
    """Choose (TR rows of the packed input, TN output lanes)."""
    # Lane tile: dense 128/256-wide when Cout is aligned, else full Cout
    # (full-dim block => no padded columns and no post-kernel slice).
    if Cout % 256 == 0 and Cout >= 256:
        TN = 256
    elif Cout % 128 == 0:
        TN = 128
    else:
        TN = Cout

    # Row tile: ~1024 output pixels per step, capped so the activation block
    # stays small (<= ~8 MiB single-buffered), and capped to give the
    # "parallel" M axis >= 2 steps so both v7x TensorCores get work.
    tr = max(1, 1024 // max(1, Wk))
    x_row_bytes = 2 * Wk * K2 * 4
    tr = min(tr, max(1, (8 << 20) // x_row_bytes))
    if R >= 2:
        tr = min(tr, -(-R // 2))          # ceil(R/2): at least two M steps
    tr = min(tr, R)
    # Output block's second-to-last dim (tr*Wk) must be %8 or the full dim.
    if (tr * Wk) % 8 != 0 and tr != R:    # only the Wk == 1 fallback path
        tr = R if R <= 8 else max(8, (tr // 8) * 8)
    return tr, TN


def _fused_conv_bn_relu(x4, w2, bias, out_dtype):
    """x4: (R, 2, Wk, 2*Cin) -> (R*Wk, Cout), fused matmul + bias + ReLU."""
    R, _, Wk, K2 = x4.shape
    Cout = w2.shape[-1]
    M = R * Wk
    out_itemsize = jnp.dtype(out_dtype).itemsize

    TR, TN = _pick_tiles(R, Wk, K2, Cout)
    grid = (pl.cdiv(R, TR), Cout // TN)

    # Real double-buffered footprint + headroom, clamped to 16-32 MiB
    # (never request all of v7x's 64 MiB physical VMEM).
    x_blk = TR * 2 * Wk * K2 * x4.dtype.itemsize
    w_blk = 2 * K2 * TN * 2
    o_blk = TR * Wk * TN * out_itemsize
    b_blk = TN * 4
    vmem_limit = int(min(max(2 * (x_blk + w_blk + o_blk + b_blk) + (4 << 20),
                             16 << 20), 32 << 20))

    cost = pl.CostEstimate(
        flops=2 * M * (2 * K2) * Cout,
        transcendentals=0,
        bytes_accessed=int(x4.size * x4.dtype.itemsize
                           + w2.size * 2 + bias.size * 4
                           + M * Cout * out_itemsize),
    )

    out = pl.pallas_call(
        _ds2_kernel,
        out_shape=jax.ShapeDtypeStruct((M, Cout), out_dtype),
        grid_spec=pltpu.PrefetchScalarGridSpec(
            num_scalar_prefetch=0,
            grid=grid,
            in_specs=[
                # activations stream along M; same block stays resident across j
                pl.BlockSpec((TR, 2, Wk, K2), lambda i, j: (i, 0, 0, 0)),
                # folded weights / bias pinned across the M axis
                pl.BlockSpec((2, K2, TN), lambda i, j: (0, 0, j)),
                pl.BlockSpec((1, TN), lambda i, j: (0, j)),
            ],
            out_specs=pl.BlockSpec((TR * Wk, TN), lambda i, j: (i, j)),
        ),
        compiler_params=pltpu.CompilerParams(
            dimension_semantics=("parallel", "parallel"),   # megacore on v7x
            vmem_limit_bytes=vmem_limit,
        ),
        cost_estimate=cost,
    )(x4, w2, bias)
    return out


# ---------------------------------------------------------------------------
# Parameters (BN folded into scale/bias, then scale folded into the weight)
# ---------------------------------------------------------------------------

def make_downsample_x2_params(key, cin, cout, eps=1e-5):
    k1, k2, k3, k4, k5 = jax.random.split(key, 5)
    w = 0.05 * jax.random.normal(k1, (2, 2, cin, cout), jnp.float32)  # (kh,kw,Ci,Co)
    gamma = 1.0 + 0.1 * jax.random.normal(k2, (cout,), jnp.float32)
    beta = 0.1 * jax.random.normal(k3, (cout,), jnp.float32)
    mean = 0.1 * jax.random.normal(k4, (cout,), jnp.float32)
    var = 1.0 + 0.1 * jax.random.uniform(k5, (cout,), jnp.float32)
    scale = gamma / jnp.sqrt(var + eps)
    bias = beta - mean * scale
    return {"w": w, "scale": scale, "bias": bias}


def fold_params(p):
    """Fold BN scale into the conv weight; reshape to (kh, kw*Cin, Cout) bf16."""
    kh, kw, cin, cout = p["w"].shape
    w2 = (p["w"] * p["scale"]).reshape(kh, kw * cin, cout).astype(jnp.bfloat16)
    bias = p["bias"].reshape(1, cout).astype(jnp.float32)
    return {"w2": w2, "bias": bias}


# ---------------------------------------------------------------------------
# Forward passes
# ---------------------------------------------------------------------------

@functools.partial(jax.jit, static_argnames=("out_dtype",))
def downsample_x2_forward_nhwc(x, params, out_dtype=jnp.bfloat16):
    """Channels-last forward: (N, H, W, Cin) -> (N, H//2, W//2, Cout)."""
    N, H, W, Cin = x.shape
    Ho, Wo = H // 2, W // 2                       # PyTorch floor-crops odd dims
    if (H % 2) or (W % 2):
        x = x[:, :2 * Ho, :2 * Wo, :]
    K2 = 2 * Cin

    if Wo % 8 == 0:
        # Space-to-depth folded into the kernel: this reshape is a pure view.
        x4 = x.reshape(N * Ho, 2, Wo, K2)
    else:
        # TODO(synk): non-8-aligned Wo falls back to a materialized im2col
        # (one extra HBM pass); the fused path needs Wo % 8 == 0 so the
        # in-kernel (TR, Wo, K2) -> (TR*Wo, K2) reshape is a no-op relayout.
        x4 = (x.reshape(N, Ho, 2, Wo, 2, Cin)
                .transpose(0, 1, 3, 2, 4, 5)
                .reshape(N * Ho * Wo, 2, 1, K2))

    y = _fused_conv_bn_relu(x4, params["w2"], params["bias"], out_dtype)
    return y.reshape(N, Ho, Wo, -1)


@functools.partial(jax.jit, static_argnames=("out_dtype",))
def downsample_x2_forward(x_nchw, params, out_dtype=jnp.bfloat16):
    """NCHW wrapper matching the PyTorch module. The NCHW<->NHWC transposes are
    pure layout glue; in a channels-last network call the *_nhwc entry point."""
    x = jnp.transpose(x_nchw, (0, 2, 3, 1))
    y = downsample_x2_forward_nhwc(x, params, out_dtype=out_dtype)
    return jnp.transpose(y, (0, 3, 1, 2))


def downsample_x2_reference(x_nchw, folded):
    """Pure-JAX reference (XLA conv) mirroring the kernel's bf16 operand
    quantization; accumulation, bias and ReLU in f32."""
    cin = x_nchw.shape[1]
    w2 = folded["w2"].astype(jnp.float32)
    kh, kwc, cout = w2.shape
    w_hwio = w2.reshape(kh, kwc // cin, cin, cout)
    x = jnp.transpose(x_nchw, (0, 2, 3, 1)).astype(jnp.bfloat16).astype(jnp.float32)
    y = lax.conv_general_dilated(x, w_hwio, window_strides=(2, 2), padding="VALID",
                                 dimension_numbers=("NHWC", "HWIO", "NHWC"))
    y = jnp.maximum(y + folded["bias"].reshape(-1)[None, None, None, :], 0.0)
    return jnp.transpose(y, (0, 3, 1, 2))


# ---------------------------------------------------------------------------
# Main
# ---------------------------------------------------------------------------

if __name__ == "__main__":
    N, Cin, Cout, H, W = 2, 8, 32, 16, 16

    key = jax.random.PRNGKey(0)
    kx, kp = jax.random.split(key)
    x = jax.random.normal(kx, (N, Cin, H, W), jnp.float32)        # NCHW, like PyTorch
    params = fold_params(make_downsample_x2_params(kp, Cin, Cout))

    y = jax.block_until_ready(downsample_x2_forward(x, params))
    assert y.shape == (N, Cout, H // 2, W // 2), y.shape
    assert y.dtype == jnp.bfloat16, y.dtype

    y_ref = jax.block_until_ready(downsample_x2_reference(x, params))
    max_err = float(jnp.max(jnp.abs(y.astype(jnp.float32) - y_ref)))
    assert max_err < 5e-2, f"max abs error {max_err}"

    print("KERNEL_OK")
</pallas_src>

<mosaic_0001>
module attributes {stable_mosaic.version = 11 : i64} {
  func.func @_ds2_kernel(%arg0: i32, %arg1: i32, %arg2: memref<8x2x8x16xf32, #tpu.memory_space<vmem>>, %arg3: memref<2x16x32xbf16, #tpu.memory_space<vmem>>, %arg4: memref<1x32xf32, #tpu.memory_space<vmem>>, %arg5: memref<64x32xbf16, #tpu.memory_space<vmem>>) attributes {dimension_semantics = [#tpu.dimension_semantics<parallel>, #tpu.dimension_semantics<parallel>], iteration_bounds = array<i64: 2, 1>, scalar_prefetch = 0 : i64, scratch_operands = 0 : i64, tpu.core_type = #tpu.core_type<tc>, window_params = [{transform_indices = @transform_0, window_bounds = array<i64: 8, 2, 8, 16>}, {transform_indices = @transform_1, window_bounds = array<i64: 2, 16, 32>}, {transform_indices = @transform_2, window_bounds = array<i64: 1, 32>}, {transform_indices = @transform_3, window_bounds = array<i64: 64, 32>}]} {
    %c0 = arith.constant 0 : index
    %c0_0 = arith.constant 0 : index
    %c0_1 = arith.constant 0 : index
    %c0_2 = arith.constant 0 : index
    %0 = vector.load %arg2[%c0, %c0_0, %c0_1, %c0_2] : memref<8x2x8x16xf32, #tpu.memory_space<vmem>>, vector<8x1x8x16xf32>
    %1 = vector.shape_cast %0 : vector<8x1x8x16xf32> to vector<8x8x16xf32>
    %2 = vector.shape_cast %1 : vector<8x8x16xf32> to vector<64x16xf32>
    %3 = arith.truncf %2 : vector<64x16xf32> to vector<64x16xbf16>
    %c0_3 = arith.constant 0 : index
    %c1 = arith.constant 1 : index
    %c0_4 = arith.constant 0 : index
    %c0_5 = arith.constant 0 : index
    %4 = vector.load %arg2[%c0_3, %c1, %c0_4, %c0_5] : memref<8x2x8x16xf32, #tpu.memory_space<vmem>>, vector<8x1x8x16xf32>
    %5 = vector.shape_cast %4 : vector<8x1x8x16xf32> to vector<8x8x16xf32>
    %6 = vector.shape_cast %5 : vector<8x8x16xf32> to vector<64x16xf32>
    %7 = arith.truncf %6 : vector<64x16xf32> to vector<64x16xbf16>
    %c0_6 = arith.constant 0 : index
    %c0_7 = arith.constant 0 : index
    %c0_8 = arith.constant 0 : index
    %8 = vector.load %arg3[%c0_6, %c0_7, %c0_8] : memref<2x16x32xbf16, #tpu.memory_space<vmem>>, vector<1x16x32xbf16>
    %9 = vector.shape_cast %8 : vector<1x16x32xbf16> to vector<16x32xbf16>
    %cst = arith.constant dense<0.000000e+00> : vector<64x32xf32>
    %10 = tpu.matmul %3, %9, %cst {dimension_numbers = #tpu.dot_dimension_numbers<[1], [0], [0], [1], [0, 0, 1, 1], [], []>} : vector<64x16xbf16>, vector<16x32xbf16>, vector<64x32xf32> -> vector<64x32xf32>
    %c1_9 = arith.constant 1 : index
    %c0_10 = arith.constant 0 : index
    %c0_11 = arith.constant 0 : index
    %11 = vector.load %arg3[%c1_9, %c0_10, %c0_11] : memref<2x16x32xbf16, #tpu.memory_space<vmem>>, vector<1x16x32xbf16>
    %12 = vector.shape_cast %11 : vector<1x16x32xbf16> to vector<16x32xbf16>
    %cst_12 = arith.constant dense<0.000000e+00> : vector<64x32xf32>
    %13 = tpu.matmul %7, %12, %cst_12 {dimension_numbers = #tpu.dot_dimension_numbers<[1], [0], [0], [1], [0, 0, 1, 1], [], []>} : vector<64x16xbf16>, vector<16x32xbf16>, vector<64x32xf32> -> vector<64x32xf32>
    %14 = arith.addf %10, %13 : vector<64x32xf32>
    %c0_13 = arith.constant 0 : index
    %c0_14 = arith.constant 0 : index
    %15 = vector.load %arg4[%c0_13, %c0_14] : memref<1x32xf32, #tpu.memory_space<vmem>>, vector<1x32xf32>
    %16 = vector.broadcast %15 : vector<1x32xf32> to vector<64x32xf32>
    %17 = arith.addf %14, %16 : vector<64x32xf32>
    %cst_15 = arith.constant 0.000000e+00 : f32
    %18 = vector.broadcast %cst_15 : f32 to vector<64x32xf32>
    %19 = arith.maximumf %17, %18 : vector<64x32xf32>
    %20 = arith.truncf %19 : vector<64x32xf32> to vector<64x32xbf16>
    %c0_16 = arith.constant 0 : index
    %c0_17 = arith.constant 0 : index
    %21 = vector.load %arg5[%c0_16, %c0_17] : memref<64x32xbf16, #tpu.memory_space<vmem>>, vector<64x32xbf16>
    tpu.vector_store %arg5[%c0_16, %c0_17], %20 {strides = array<i32>} : memref<64x32xbf16, #tpu.memory_space<vmem>>, vector<64x32xbf16>,
    return
  }
  func.func @transform_0(%arg0: i32, %arg1: i32) -> (i32, i32, i32, i32) {
    %c0_i32 = arith.constant 0 : i32
    %c0_i32_0 = arith.constant 0 : i32
    %c0_i32_1 = arith.constant 0 : i32
    %c0_i32_2 = arith.constant 0 : i32
    return %arg0, %c0_i32, %c0_i32_0, %c0_i32_1 : i32, i32, i32, i32
  }
  func.func @transform_1(%arg0: i32, %arg1: i32) -> (i32, i32, i32) {
    %c0_i32 = arith.constant 0 : i32
    %c0_i32_0 = arith.constant 0 : i32
    %c0_i32_1 = arith.constant 0 : i32
    return %c0_i32, %c0_i32_0, %arg1 : i32, i32, i32
  }
  func.func @transform_2(%arg0: i32, %arg1: i32) -> (i32, i32) {
    %c0_i32 = arith.constant 0 : i32
    %c0_i32_0 = arith.constant 0 : i32
    return %c0_i32, %arg1 : i32, i32
  }
  func.func @transform_3(%arg0: i32, %arg1: i32) -> (i32, i32) {
    %c0_i32 = arith.constant 0 : i32
    return %arg0, %arg1 : i32, i32
  }
}

</mosaic_0001>

<bundles_post_ra>
// kernel: downsample_x2_forward_nhwc.1
= control target key start
LH: loop header
LB: loop body
LE: loop exit
PB: predicated region body
PF: predicated region fallthrough
CT: control target
= control target key end

     0   :  { %8 = vsyncpa [#allocation3], 0  ;;  %s994_s0 = inlined_call_operand.vmem [shape: f32[16,2,8,16], index: 0, kind: input, shape index: {}]   ;;  %s995_s1 = inlined_call_operand.vmem [shape: bf16[2,16,32], index: 1, kind: input, shape index: {}]   ;;  %s996_s2 = inlined_call_operand.vmem [shape: f32[1,32], index: 2, kind: input, shape index: {}]   ;;  %s997_s3 = inlined_call_operand.hbm [shape: bf16[128,32], index: 3, kind: output, shape index: {}]  }
   0x1   :  { %10 = vsyncpa [#allocation3 + $0x1], 0  ;;  %s841_s12 = smov 0   ;;  %s843_s13 = smov 0  }
   0x2   :  { %s845_s14 = smov 0   ;;  %s847_s15 = smov 0  }
   0x3   :  { %s849_s16 = smov 0   ;;  %s851_s17 = smov 0  }
   0x4 LB: > { %s596_s18 = sadd.s32 4294967295, %s816_s17   ;;  %s597_s19 = sadd.s32 4294967294, %s816_s17   ;;  %s816_s17 = sphi %s851_s17, %s16_s17   ;;  %s812_s16 = sphi %s849_s16, %s1004_s16   ;;  %s808_s15 = sphi %s847_s15, %s1003_s15   ;;  %s804_s14 = sphi %s845_s14, %s1002_s14   ;;  %s800_s13 = sphi %s843_s13, %s1001_s13   ;;  %s796_s12 = sphi %s841_s12, %s1000_s12  }
   0x5   : > { %s28_s20 = sadd.s32 1, %s812_s16  ;;  %s115_s21 = sadd.s32 1, %s804_s14 }
   0x6   : > { %p30_p0 = scmp.ge.s32.totalorder %s28_s20, 2  ;;  %p125_p1 = scmp.ne.s32.totalorder %s804_s14, %s800_s13 }
   0x7   : > { %p126_p2 = scmp.eq.s32.totalorder %s596_s18, 1  ;;  %p131_p3 = scmp.ne.s32.totalorder %s800_s13, %s796_s12 }
   0x8   : > { %s1006_s20 = smov (%p30_p0, %s28_s20), 0  ;;  %p132_p5 = scmp.eq.s32.totalorder %s597_s19, 1 }
   0x9   : > { %p881_p4 = por %p126_p2, %p125_p1  ;;  %s110_s23 = ssub.s32 %s812_s16, %s1006_s20 }
   0xa   : > { %p602_p6 = scmp.ge.s32.totalorder %s816_s17, 1  ;;  %p113_p7 = scmp.eq.s32.totalorder %s110_s23, 0 }
   0xb   : > { %p888_p8 = por %p132_p5, %p131_p3  ;;  %p173_p9 = scmp.lt.s32.totalorder %s816_s17, 3 }
   0xc   : > { %s894_s25 = scalar_select %p113_p7, %s804_s14, %s115_s21  }
   0xd   : > { %p174_p10 = pnand %p602_p6, %p173_p9 }
   0xe   : > { %s604_s28 = sshll.u32 (!%p174_p10), %s808_s15, 3  ;;  %s202_s8 = sand.u32 (!%p174_p10), 1, %s800_s13  }
   0xf   : > { %177 = sbr.rel (%p174_p10) target bundleno = 257 (0x101), region = 32  ;;  %p206_p11 = scmp.lt.s32.totalorder (!%p174_p10), %s604_s28, 15 }
  0x10   : > { %s603_s11 = sshll.u32 (!%p174_p10), %s202_s8, 5  ;;  %s650_s19 = sshll.u32 (!%p174_p10), %s808_s15, 9 }
  0x11   : > { %s920_s18 = scalar_lea.vmem (!%p174_p10), [#allocation2], %s603_s11  ;;  %s939_s27 = scalar_lea.hbm (!%p174_p10), %s997_s3, %s650_s19 }
  0x12   : > { %s497_s21 = sshll.u32 (!%p174_p10), %s920_s18, 4  ;;  %s949_s15 = scalar_lea.sflag (!%p174_p10), [#allocation3], %s202_s8  ;;  %s941_s21 = int_to_ptr.vmem [resolvable:$true] %s497_s21 }
  0x13   : > { %s818_s29 = smov (!%p174_p10), [#allocation2]  }
  0x14   : > { %v738_v0 = vld [vmem:[%s995_s1 + $0x8] sm:$0xff]   ;;  %v739_v1 = vld [vmem:[%s995_s1] sm:$0xff]   ;;  %s1008_s28 = smov (!%p206_p11, %s604_s28), 15  ;;  %vm257_vm0 = vcmask 130048   ;;  %vm473_vm1 = vcmask 257024   ;;  %s744_s30 = sshll.u32 %s818_s29, 4  ;;  %s745_s30 = int_to_ptr.vmem [resolvable:$false] %s744_s30 }
  0x15   : > { %661 = vmatprep.subr.bf16.mxu0 %v738_v0  ;;  %671 = vmatprep.subr.bf16.mxu1 %v739_v1  ;;  %s641_s4 = sshll.u32 %s1008_s28, 4  ;;  %v627_v28 = vld [vmem:[%s996_s2] ss:$0 sm:$0xff]  ;;  %s740_s28 = scalar_lea.vmem %s941_s21, 512 }
  0x16   : > { %662 = vmatpush3.bf16.msra.mxu0 %v738_v0  ;;  %672 = vmatpush3.bf16.msra.mxu1 %v739_v1  ;;  %s210_s7 = scalar_lea.vmem %s994_s0, %s641_s4  ;;  %p741_p12 = scmp.ne.s32.totalorder %s941_s21, %s740_s28 }
  0x17   : > { %v607_v2 = vld [vmem:[%s210_s7 + $0x8] sm:$0xff]  ;;  %v608_v3 = vld [vmem:[%s210_s7 + $0x18] sm:$0xff]  ;;  %v221_v4 = vld [vmem:[%s210_s7] sm:$0xff]  ;;  %s746_s4 = scalar_lea.vmem %s745_s30, 1024  ;;  %p747_p1 = scmp.lt.s32.totalorder %s941_s21, %s745_s30 }
  0x18   : > { %v242_v5 = vpack.c.bf16 %v608_v3, %v607_v2  ;;  %v222_v6 = vld [vmem:[%s210_s7 + $0x10] sm:$0xff]  ;;  %v609_v7 = vld [vmem:[%s210_s7 + $0x28] sm:$0xff]  ;;  %v610_v8 = vld [vmem:[%s210_s7 + $0x38] sm:$0xff]  ;;  %p742_p13 = pnand %p741_p12, %p881_p4  ;;  %p748_p2 = scmp.lt.s32.totalorder %s746_s4, %s740_s28 }
  0x19   : > { %v229_v9 = vpack.c.bf16 %v222_v6, %v221_v4  ;;  %v243_v10 = vpack.c.bf16 %v610_v8, %v609_v7  ;;  %v223_v11 = vld [vmem:[%s210_s7 + $0x20] sm:$0xff]  ;;  %v224_v12 = vld [vmem:[%s210_s7 + $0x30] sm:$0xff]  ;;  %v611_v13 = vld [vmem:[%s210_s7 + $0x48] sm:$0xff] }
  0x1a   : > { %663 = vmatprep.mubr.msk.bf16.mxu0 %vm257_vm0, %v242_v5  ;;  %v230_v14 = vpack.c.bf16 %v224_v12, %v223_v11  ;;  %v612_v15 = vld [vmem:[%s210_s7 + $0x58] sm:$0xff]  ;;  %v225_v16 = vld [vmem:[%s210_s7 + $0x40] sm:$0xff]  ;;  %v226_v17 = vld [vmem:[%s210_s7 + $0x50] sm:$0xff]  ;;  %p743_p0 = pneg %p742_p13  ;;  %p749_p3 = por %p748_p2, %p747_p1 }
  0x1b   : > { %673 = vmatprep.mubr.msk.bf16.mxu1 %vm257_vm0, %v229_v9  ;;  %664 = vmatmul.mubr.msk.bf16.vlgmr.msra.gmra.mxu0 %vm257_vm0, %v243_v10  ;;  %v244_v18 = vpack.c.bf16 %v612_v15, %v611_v13  ;;  %v231_v19 = vpack.c.bf16 %v226_v17, %v225_v16  ;;  %v613_v20 = vld [vmem:[%s210_s7 + $0x68] sm:$0xff]  ;;  %v614_v21 = vld [vmem:[%s210_s7 + $0x78] sm:$0xff]  ;;  %v227_v22 = vld [vmem:[%s210_s7 + $0x60] sm:$0xff] }
  0x1c   : > { %674 = vmatmul.mubr.msk.bf16.vlgmr.msra.gmra.mxu1 %vm257_vm0, %v230_v14  ;;  %v228_v23 = vld [vmem:[%s210_s7 + $0x70] sm:$0xff]  ;;  %v245_v24 = vpack.c.bf16 %v614_v21, %v613_v20  ;;  %p750_p5 = pnand %p749_p3, %p743_p0 }
  0x1d   : > { %667 = vmatprep.mubr.msk.bf16.mxu0 %vm257_vm0, %v244_v18  ;;  %677 = vmatprep.mubr.msk.bf16.mxu1 %vm257_vm0, %v231_v19  ;;  %v232_v25 = vpack.c.bf16 %v228_v23, %v227_v22 }
  0x23   : > { %668 = vmatmul.mubr.msk.bf16.gmra.mxu0 %vm257_vm0, %v245_v24 }
  0x24   : > { %678 = vmatmul.mubr.msk.bf16.gmra.mxu1 %vm257_vm0, %v232_v25 }
  0xdb   : > { %v665_v26 = vpop.f32.mrf.mxu0 }
  0xdc   : > { %v675_v27 = vpop.f32.mrf.mxu1 }
  0xdd   : > { %v396_v29 = vadd.f32 %v675_v27, %v665_v26  ;;  %v304_v30 = vpop.f32.mrf.mxu0 }
  0xde   : > { %v387_v31 = vpop.f32.mrf.mxu1 }
  0xdf   : > { %v427_v32 = vadd.f32 %v627_v28, %v396_v29  ;;  %v388_v33 = vadd.f32 %v387_v31, %v304_v30  ;;  %v666_v34 = vpop.f32.mrf.mxu0 }
  0xe0   : > { %v676_v35 = vpop.f32.mrf.mxu1 }
  0xe1   : > { %v435_v36 = vmax.f32 %v427_v32, 0.0  ;;  %v425_v37 = vadd.f32 %v627_v28, %v388_v33  ;;  %v399_v38 = vadd.f32 %v676_v35, %v666_v34  ;;  %v307_v39 = vpop.f32.mrf.mxu0 }
  0xe2   : > { %v390_v40 = vpop.f32.mrf.mxu1 }
  0xe3   : > { %v644_v41 = vpack.c.bf16 %v435_v36, %v435_v36  ;;  %v433_v42 = vmax.f32 %v425_v37, 0.0  ;;  %v428_v43 = vadd.f32 %v627_v28, %v399_v38  ;;  %v391_v44 = vadd.f32 %v390_v40, %v307_v39  ;;  %v669_v45 = vpop.f32.mrf.mxu0 }
  0xe4   : > { %v679_v46 = vpop.f32.mrf.mxu1 }
  0xe5   : > { %476 = vst.msk [vmem:[%s920_s18 + $0x8] sm:$0xf] %vm473_vm1, %v644_v41  ;;  %v642_v47 = vpack.c.bf16 %v433_v42, %v433_v42  ;;  %v436_v48 = vmax.f32 %v428_v43, 0.0  ;;  %v426_v49 = vadd.f32 %v627_v28, %v391_v44  ;;  %v412_v50 = vadd.f32 %v679_v46, %v669_v45  ;;  %v320_v51 = vpop.f32.mrf.mxu0 }
  0xe6   : > { %v403_v52 = vpop.f32.mrf.mxu1 }
  0xe7   : > { %474 = vst.msk [vmem:[%s920_s18] sm:$0xf] %vm473_vm1, %v642_v47  ;;  %v645_v53 = vpack.c.bf16 %v436_v48, %v436_v48  ;;  %v434_v54 = vmax.f32 %v426_v49, 0.0  ;;  %v431_v55 = vadd.f32 %v627_v28, %v412_v50  ;;  %v404_v56 = vadd.f32 %v403_v52, %v320_v51  ;;  %v670_v57 = vpop.f32.mrf.mxu0 }
  0xe8   : > { %v680_v58 = vpop.f32.mrf.mxu1 }
  0xe9   : > { %477 = vst.msk [vmem:[%s920_s18 + $0xc] sm:$0xf] %vm473_vm1, %v645_v53  ;;  %v643_v59 = vpack.c.bf16 %v434_v54, %v434_v54  ;;  %v439_v60 = vmax.f32 %v431_v55, 0.0  ;;  %v429_v61 = vadd.f32 %v627_v28, %v404_v56  ;;  %v415_v62 = vadd.f32 %v680_v58, %v670_v57  ;;  %v323_v63 = vpop.f32.mrf.mxu0 }
  0xea   : > { %v406_v0 = vpop.f32.mrf.mxu1 }
  0xeb   : > { %475 = vst.msk [vmem:[%s920_s18 + $0x4] sm:$0xf] %vm473_vm1, %v643_v59  ;;  %v648_v1 = vpack.c.bf16 %v439_v60, %v439_v60  ;;  %v437_v2 = vmax.f32 %v429_v61, 0.0  ;;  %v432_v3 = vadd.f32 %v627_v28, %v415_v62  ;;  %v407_v4 = vadd.f32 %v406_v0, %v323_v63 }
  0xed   : > { %480 = vst.msk [vmem:[%s920_s18 + $0x18] sm:$0xf] %vm473_vm1, %v648_v1  ;;  %v646_v5 = vpack.c.bf16 %v437_v2, %v437_v2  ;;  %v440_v6 = vmax.f32 %v432_v3, 0.0  ;;  %v430_v7 = vadd.f32 %v627_v28, %v407_v4 }
  0xef   : > { %478 = vst.msk [vmem:[%s920_s18 + $0x10] sm:$0xf] %vm473_vm1, %v646_v5  ;;  %v649_v8 = vpack.c.bf16 %v440_v6, %v440_v6  ;;  %v438_v9 = vmax.f32 %v430_v7, 0.0 }
  0xf1   : > { %481 = vst.msk [vmem:[%s920_s18 + $0x1c] sm:$0xf] %vm473_vm1, %v649_v8  ;;  %v647_v10 = vpack.c.bf16 %v438_v9, %v438_v9 }
  0xf3   : > { %479 = vst.msk [vmem:[%s920_s18 + $0x14] sm:$0xf] %vm473_vm1, %v647_v10 }
  0xf4   : > { %753 = shalt.err (!%p750_p5)
}
  0xf5   : > { %s754_s5 = scalar_lea.hbm %s939_s27, 512  ;;  %s758_s8 = scalar_lea.hbm %s997_s3, 1024 }
  0xf6   : > { %p755_p6 = scmp.ne.s32.totalorder %s939_s27, %s754_s5  ;;  %p759_p10 = scmp.lt.s32.totalorder %s939_s27, %s997_s3 }
  0xf7   : > { %p760_p11 = scmp.lt.s32.totalorder %s758_s8, %s754_s5 }
  0xf8   : > { %p756_p7 = pnand %p755_p6, %p881_p4 }
  0xf9   : > { %p761_p12 = por %p760_p11, %p759_p10 }
  0xfa   : > { %p757_p9 = pneg %p756_p7 }
  0xfc   : > { %p762_p13 = pnand %p761_p12, %p757_p9 }
  0xfe   : > { %765 = shalt.err (!%p762_p13)
}
  0xff   : > { %s819_s11 = smov 64   ;;  %s820_s18 = smov 4  }
 0x100   : > { %681 = dma.vmem_to_hbm [thread:$0]  (%p881_p4), %s941_s21, 512, %s939_s27, %s949_s15, %s819_s11, %s819_s11, %s820_s18  }
 0x101 PF: > { %p687_p0 = scmp.ge.s32.totalorder %s816_s17, 2  ;;  %s512_s19 = sand.u32 1, %s796_s12  }
 0x102   : > { %s513_s23 = scalar_lea.sflag [#allocation3], %s512_s19 }
 0x103   : > { %p684_p1 = pnand %p687_p0, %p888_p8 }
 0x105   : > { %p685_p2 = pneg %p684_p1 }
 0x107   : > { %791 = dma.done.wait (%p685_p2), %s513_s23, 512  }
 0x108   : > { %793 = vsyncadd (%p685_p2), %s513_s23, 4294966784  ;;  %s16_s17 = sadd.s32 1, %s816_s17   ;;  %s1000_s12 = smov %s800_s13 }
 0x109   : > { %p13_p3 = scmp.ge.s32.totalorder %s16_s17, 4   ;;  %s1001_s13 = smov %s804_s14 }
 0x10a   : > { %s1002_s14 = smov %s894_s25  ;;  %s1003_s15 = smov %s812_s16 }
 0x10b   : > { %s1004_s16 = smov %s1006_s20  ;;  %15 = sbr.rel (!%p13_p3) target bundleno = 4 (0x4), region = 75 }
 0x110   :  { %518 = vsyncpa [#allocation3], 1 }
 0x111   :  { %520 = vsyncpa [#allocation3 + $0x1], 1 }

</bundles_post_ra>
